<compile_context>
chip_gen: v7x
topology: tpu7x:2x2x1
jax: 0.10.0
libtpu: 0.0.40
codegen_flags: <defaults>
</compile_context>

<pallas_src>
import functools

import jax
import jax.numpy as jnp
from jax.experimental import pallas as pl
from jax.experimental.pallas import tpu as pltpu


def _leaky_relu(z):
    return jnp.where(z > 0, z, 0.1 * z)


def _gate_from_pooled(avg, mx, w):
    """avg, mx: (C, 1) f32; w: (C, C) f32 -> sigmoid gate, (C, 1) f32."""
    pooled = jnp.concatenate([avg, mx], axis=-1)                    # (C, 2)
    # Single fused MXU dot for both pooled branches: halves MXU pushes/drains vs
    # two (C, 1) matvecs and removes a serialized dependency on the critical path.
    z = _leaky_relu(jnp.dot(w, pooled, preferred_element_type=jnp.float32))
    # Exactly two columns: lane reduce == avg_branch + max_branch.
    return jax.nn.sigmoid(jnp.sum(z, axis=-1, keepdims=True))       # (C, 1)


# ---------------------------------------------------------------------------
# Path A: whole (C, HW) slab resident in VMEM (small feature maps).
# ---------------------------------------------------------------------------
def _ca_fused_kernel(x_ref, w_ref, o_ref):
    x32 = x_ref[0].astype(jnp.float32)            # (C, HW); reduce in f32
    w = w_ref[...].astype(jnp.float32)            # (C, C)

    avg = jnp.mean(x32, axis=-1, keepdims=True)   # (C, 1)  AdaptiveAvgPool2d(1)
    mx = jnp.max(x32, axis=-1, keepdims=True)     # (C, 1)  AdaptiveMaxPool2d(1)
    gate = _gate_from_pooled(avg, mx, w)

    o_ref[0] = (gate * x32).astype(o_ref.dtype)   # broadcast over spatial


# ---------------------------------------------------------------------------
# Path B, pass 1: streamed pooling over spatial tiles -> per-channel gate.
# ---------------------------------------------------------------------------
def _ca_pool_gate_kernel(x_ref, w_ref, gate_ref, sum_sc, max_sc, *, hw, tile):
    t = pl.program_id(1)

    @pl.when(t == 0)
    def _():
        sum_sc[...] = jnp.zeros_like(sum_sc)
        max_sc[...] = jnp.full_like(max_sc, -jnp.inf)

    x32 = x_ref[0].astype(jnp.float32)            # (C, T)
    # Mask lanes past the true spatial extent (remainder tile): pad with 0 for
    # the sum and -inf for the max so padding never contaminates the pooling.
    col = t * tile + jax.lax.broadcasted_iota(jnp.int32, x32.shape, 1)
    valid = col < hw
    sum_sc[...] += jnp.sum(jnp.where(valid, x32, 0.0), axis=-1, keepdims=True)
    max_sc[...] = jnp.maximum(
        max_sc[...],
        jnp.max(jnp.where(valid, x32, -jnp.inf), axis=-1, keepdims=True))

    @pl.when(t == pl.num_programs(1) - 1)
    def _():
        w = w_ref[...].astype(jnp.float32)
        avg = sum_sc[...] * (1.0 / hw)            # true HW denominator
        gate_ref[0] = _gate_from_pooled(avg, max_sc[...], w)


# ---------------------------------------------------------------------------
# Path B, pass 2: elementwise gate * x over spatial tiles (fully parallel).
# ---------------------------------------------------------------------------
def _ca_scale_kernel(gate_ref, x_ref, o_ref):
    gate = gate_ref[0]                            # (C, 1) f32
    o_ref[0] = (gate * x_ref[0].astype(jnp.float32)).astype(o_ref.dtype)


def channel_attention(x_nchw, conv_weight, *, force_tiled=False, spatial_tile=None):
    """x_nchw: (N, C, H, W); conv_weight: (C, C, 1, 1). Matches PyTorch ChannelAttention."""
    N, C, H, W = x_nchw.shape
    HW = H * W
    x_flat = x_nchw.reshape(N, C, HW)
    w = conv_weight.reshape(C, C)
    itemsize = jnp.dtype(x_nchw.dtype).itemsize

    # Resident-path VMEM need: double-buffered input + output slabs + weight bufs.
    resident_bytes = 2 * 2 * C * HW * itemsize + 2 * C * C * 4
    # Threshold re-derived with v7x headroom in mind (64 MiB physical VMEM).
    resident_budget = 24 * 1024 * 1024

    if not force_tiled and resident_bytes <= resident_budget:
        out_flat = pl.pallas_call(
            _ca_fused_kernel,
            out_shape=jax.ShapeDtypeStruct((N, C, HW), x_nchw.dtype),
            grid_spec=pltpu.PrefetchScalarGridSpec(
                num_scalar_prefetch=0,
                grid=(N,),
                in_specs=[
                    pl.BlockSpec((1, C, HW), lambda i: (i, 0, 0)),
                    pl.BlockSpec((C, C), lambda i: (0, 0)),
                ],
                out_specs=pl.BlockSpec((1, C, HW), lambda i: (i, 0, 0)),
            ),
            compiler_params=pltpu.CompilerParams(
                dimension_semantics=("parallel",),
                # Explicit: scoped-VMEM default is only 16 MiB on v5e.
                vmem_limit_bytes=min(resident_bytes + (2 << 20), 48 << 20),
            ),
        )(x_flat, w)
        return out_flat.reshape(N, C, H, W)

    # ---------------- tiled two-pass path (caps VMEM regardless of HW) -------
    if spatial_tile is None:
        # ~2 MiB per (C, T) buffer keeps every per-call footprint well under the
        # smallest scoped-VMEM default (16 MiB on v5e / 32 MiB on v6e & v7x)
        # while the DMA tiles stay big enough to run at the HBM roofline.
        t_max = max(128, ((2 * 1024 * 1024) // (C * itemsize)) // 128 * 128)
    else:
        t_max = max(128, (spatial_tile // 128) * 128)
    T = min(t_max, pl.cdiv(HW, 128) * 128)
    num_t = pl.cdiv(HW, T)

    # Pass 1: pooled stats + gate. Spatial-tile (reduction) axis last, 'arbitrary'.
    gate = pl.pallas_call(
        functools.partial(_ca_pool_gate_kernel, hw=HW, tile=T),
        out_shape=jax.ShapeDtypeStruct((N, C, 1), jnp.float32),
        grid_spec=pltpu.PrefetchScalarGridSpec(
            num_scalar_prefetch=0,
            grid=(N, num_t),
            in_specs=[
                pl.BlockSpec((1, C, T), lambda n, t: (n, 0, t)),
                # TODO(synk): for very large C, stage w into scratch once instead
                # of letting the (grid-invariant) BlockSpec double-buffer it.
                pl.BlockSpec((C, C), lambda n, t: (0, 0)),
            ],
            out_specs=pl.BlockSpec((1, C, 1), lambda n, t: (n, 0, 0)),
            scratch_shapes=[
                pltpu.VMEM((C, 1), jnp.float32),   # running sum
                pltpu.VMEM((C, 1), jnp.float32),   # running max
            ],
        ),
        compiler_params=pltpu.CompilerParams(
            dimension_semantics=("parallel", "arbitrary"),
        ),
    )(x_flat, w)

    # Pass 2: gate * x; both grid axes 'parallel' so v7x's two TCs stay busy
    # even when N is 1 (neutral on single-TC v5e/v6e).
    out_flat = pl.pallas_call(
        _ca_scale_kernel,
        out_shape=jax.ShapeDtypeStruct((N, C, HW), x_nchw.dtype),
        grid_spec=pltpu.PrefetchScalarGridSpec(
            num_scalar_prefetch=0,
            grid=(N, num_t),
            in_specs=[
                pl.BlockSpec((1, C, 1), lambda n, t: (n, 0, 0)),
                pl.BlockSpec((1, C, T), lambda n, t: (n, 0, t)),
            ],
            out_specs=pl.BlockSpec((1, C, T), lambda n, t: (n, 0, t)),
        ),
        compiler_params=pltpu.CompilerParams(
            dimension_semantics=("parallel", "parallel"),
        ),
    )(gate, x_flat)

    return out_flat.reshape(N, C, H, W)


def _reference(x, conv_weight):
    N, C, H, W = x.shape
    wmat = conv_weight.reshape(C, C)
    pooled_avg = jnp.mean(x, axis=(2, 3), keepdims=True)
    pooled_max = jnp.max(x, axis=(2, 3), keepdims=True)

    def fc(p):
        z = jnp.einsum('oc,ncij->noij', wmat, p)
        return jnp.where(z > 0, z, 0.1 * z)

    return jax.nn.sigmoid(fc(pooled_avg) + fc(pooled_max)) * x


if __name__ == "__main__":
    key = jax.random.PRNGKey(0)
    kx, kw, kx2, kw2 = jax.random.split(key, 4)

    # Path A: small resident slab (module-consistent small shape).
    N, C, H, W = 2, 4, 16, 16
    x = jax.random.normal(kx, (N, C, H, W), dtype=jnp.float32)
    conv_weight = (jax.random.normal(kw, (C, C, 1, 1), dtype=jnp.float32)
                   * (1.0 / jnp.sqrt(C)))
    out = channel_attention(x, conv_weight)
    jax.block_until_ready(out)
    ref = _reference(x, conv_weight)
    assert jnp.allclose(out, ref, atol=1e-5, rtol=1e-5), "resident path mismatch"

    # Path B: force the tiled two-pass path with a non-multiple-of-128 spatial
    # extent so the masked remainder tile and multi-tile accumulation are tested.
    N2, C2, H2, W2 = 1, 8, 24, 24          # HW = 576 = 4*128 + 64
    x2 = jax.random.normal(kx2, (N2, C2, H2, W2), dtype=jnp.float32)
    conv_weight2 = (jax.random.normal(kw2, (C2, C2, 1, 1), dtype=jnp.float32)
                    * (1.0 / jnp.sqrt(C2)))
    out2 = channel_attention(x2, conv_weight2, force_tiled=True, spatial_tile=128)
    jax.block_until_ready(out2)
    ref2 = _reference(x2, conv_weight2)
    assert jnp.allclose(out2, ref2, atol=1e-5, rtol=1e-5), "tiled path mismatch"

    print("KERNEL_OK")
</pallas_src>

<mosaic_0001>
module attributes {stable_mosaic.version = 11 : i64} {
  func.func @_ca_fused_kernel(%arg0: i32, %arg1: memref<1x4x256xf32, #tpu.memory_space<vmem>>, %arg2: memref<4x4xf32, #tpu.memory_space<vmem>>, %arg3: memref<1x4x256xf32, #tpu.memory_space<vmem>>) attributes {dimension_semantics = [#tpu.dimension_semantics<parallel>], iteration_bounds = array<i64: 2>, scalar_prefetch = 0 : i64, scratch_operands = 0 : i64, tpu.core_type = #tpu.core_type<tc>, window_params = [{transform_indices = @transform_0, window_bounds = array<i64: 1, 4, 256>}, {pipeline_mode = #tpu.pipeline_mode<synchronous>, transform_indices = @transform_1, window_bounds = array<i64: 4, 4>}, {transform_indices = @transform_2, window_bounds = array<i64: 1, 4, 256>}]} {
    %c0 = arith.constant 0 : index
    %c0_0 = arith.constant 0 : index
    %c0_1 = arith.constant 0 : index
    %0 = vector.load %arg1[%c0, %c0_0, %c0_1] : memref<1x4x256xf32, #tpu.memory_space<vmem>>, vector<1x4x256xf32>
    %1 = vector.shape_cast %0 : vector<1x4x256xf32> to vector<4x256xf32>
    %c0_2 = arith.constant 0 : index
    %c0_3 = arith.constant 0 : index
    %2 = vector.load %arg2[%c0_2, %c0_3] : memref<4x4xf32, #tpu.memory_space<vmem>>, vector<4x4xf32>
    %cst = arith.constant dense<0.000000e+00> : vector<4xf32>
    %3 = vector.multi_reduction <add>, %1, %cst [1] : vector<4x256xf32> to vector<4xf32>
    %4 = vector.shape_cast %3 : vector<4xf32> to vector<4x1xf32>
    %cst_4 = arith.constant 2.560000e+02 : f32
    %5 = vector.broadcast %cst_4 : f32 to vector<4x1xf32>
    %6 = arith.divf %4, %5 : vector<4x1xf32>
    %cst_5 = arith.constant dense<0xFF800000> : vector<4xf32>
    %7 = vector.multi_reduction <maximumf>, %1, %cst_5 [1] : vector<4x256xf32> to vector<4xf32>
    %8 = vector.shape_cast %7 : vector<4xf32> to vector<4x1xf32>
    %9 = tpu.concatenate %6, %8 in 1 : vector<4x1xf32>, vector<4x1xf32> -> vector<4x2xf32>
    %cst_6 = arith.constant dense<0.000000e+00> : vector<4x2xf32>
    %10 = tpu.matmul %2, %9, %cst_6 {dimension_numbers = #tpu.dot_dimension_numbers<[1], [0], [0], [1], [0, 0, 1, 1], [], []>} : vector<4x4xf32>, vector<4x2xf32>, vector<4x2xf32> -> vector<4x2xf32>
    %cst_7 = arith.constant 0.000000e+00 : f32
    %11 = vector.broadcast %cst_7 : f32 to vector<4x2xf32>
    %12 = arith.cmpf ogt, %10, %11 : vector<4x2xf32>
    %cst_8 = arith.constant 1.000000e-01 : f32
    %13 = vector.broadcast %cst_8 : f32 to vector<4x2xf32>
    %14 = arith.mulf %13, %10 : vector<4x2xf32>
    %15 = arith.select %12, %10, %14 : vector<4x2xi1>, vector<4x2xf32>
    %cst_9 = arith.constant dense<0.000000e+00> : vector<4xf32>
    %16 = vector.multi_reduction <add>, %15, %cst_9 [1] : vector<4x2xf32> to vector<4xf32>
    %17 = vector.shape_cast %16 : vector<4xf32> to vector<4x1xf32>
    %18 = arith.negf %17 : vector<4x1xf32>
    %19 = math.exp %18 : vector<4x1xf32>
    %cst_10 = arith.constant 1.000000e+00 : f32
    %20 = vector.broadcast %cst_10 : f32 to vector<4x1xf32>
    %21 = arith.addf %20, %19 : vector<4x1xf32>
    %22 = arith.divf %20, %21 : vector<4x1xf32>
    %23 = vector.broadcast %22 : vector<4x1xf32> to vector<4x256xf32>
    %24 = arith.mulf %23, %1 : vector<4x256xf32>
    %c0_11 = arith.constant 0 : index
    %c0_12 = arith.constant 0 : index
    %c0_13 = arith.constant 0 : index
    %25 = vector.load %arg3[%c0_11, %c0_12, %c0_13] : memref<1x4x256xf32, #tpu.memory_space<vmem>>, vector<1x4x256xf32>
    %26 = vector.shape_cast %25 : vector<1x4x256xf32> to vector<4x256xf32>
    %27 = vector.shape_cast %24 : vector<4x256xf32> to vector<1x4x256xf32>
    tpu.vector_store %arg3[%c0_11, %c0_12, %c0_13], %27 {strides = array<i32>} : memref<1x4x256xf32, #tpu.memory_space<vmem>>, vector<1x4x256xf32>,
    return
  }
  func.func @transform_0(%arg0: i32) -> (i32, i32, i32) {
    %c0_i32 = arith.constant 0 : i32
    %c0_i32_0 = arith.constant 0 : i32
    %c0_i32_1 = arith.constant 0 : i32
    return %arg0, %c0_i32, %c0_i32_0 : i32, i32, i32
  }
  func.func @transform_1(%arg0: i32) -> (i32, i32) {
    %c0_i32 = arith.constant 0 : i32
    %c0_i32_0 = arith.constant 0 : i32
    %c0_i32_1 = arith.constant 0 : i32
    return %c0_i32, %c0_i32_0 : i32, i32
  }
  func.func @transform_2(%arg0: i32) -> (i32, i32, i32) {
    %c0_i32 = arith.constant 0 : i32
    %c0_i32_0 = arith.constant 0 : i32
    %c0_i32_1 = arith.constant 0 : i32
    return %arg0, %c0_i32, %c0_i32_0 : i32, i32, i32
  }
}

</mosaic_0001>

<bundles_post_ra>
// kernel: tpu_custom_call.1
= control target key start
LH: loop header
LB: loop body
LE: loop exit
PB: predicated region body
PF: predicated region fallthrough
CT: control target
= control target key end

     0   :  { %7 = vsyncpa [#allocation3], 0  ;;  %s837_s0 = inlined_call_operand.hbm [shape: f32[2,4,256], index: 0, kind: input, shape index: {}]   ;;  %s838_s1 = inlined_call_operand.hbm [shape: f32[4,4], index: 1, kind: input, shape index: {}]   ;;  %s839_s2 = inlined_call_operand.hbm [shape: f32[2,4,256], index: 2, kind: output, shape index: {}]  }
   0x1   :  { %9 = vsyncpa [#allocation3 + $0x1], 0 }
   0x2   :  { %10 = vsyncpa [#allocation6], 0 }
   0x3   :  { %11 = vsyncpa [#allocation4], 0 }
   0x4   :  { %13 = vsyncpa [#allocation4 + $0x1], 0  ;;  %s627_s9 = smov 0   ;;  %s629_s10 = smov 0  }
   0x5   :  { %s631_s11 = smov 0   ;;  %s633_s12 = smov 0  }
   0x6 LB: > { %s648_s13 = sadd.s32 4294967295, %s605_s12   ;;  %s385_s14 = sadd.s32 4294967294, %s605_s12   ;;  %s605_s12 = sphi %s633_s12, %s863_s12   ;;  %s601_s11 = sphi %s631_s11, %s862_s11   ;;  %s597_s10 = sphi %s629_s10, %s861_s10   ;;  %s593_s9 = sphi %s627_s9, %s860_s9  }
   0x7   : > { %p39_p0 = scmp.ne.s32.totalorder %s597_s10, %s593_s9  ;;  %p840_p1 = scmp.eq.s32.totalorder %s648_s13, 0 }
   0x8   : > { %p90_p3 = scmp.eq.s32.totalorder %s385_s14, 1  ;;  %p386_p5 = scmp.ge.s32.totalorder %s605_s12, 1 }
   0x9   : > { %p657_p4 = por %p840_p1, %p39_p0  ;;  %p97_p7 = scmp.lt.s32.totalorder %s605_s12, 3 }
   0xa   : > { %p662_p6 = por %p90_p3, %p39_p0  ;;  %s607_s18 = smov [#allocation5]  }
   0xb   : > { %s843_s15 = scalar_select %p657_p4, 1, 0 }
   0xc   : > { %s844_s16 = scalar_select %p662_p6, 1, 0 }
   0xd   : > { %p667_p8 = pnand %p386_p5, %p97_p7  ;;  %s110_s19 = sshll.u32 %s607_s18, 4  ;;  %s111_s19 = int_to_ptr.vmem [resolvable:$true] %s110_s19 }
   0xe   : > { %s675_s20 = sadd.s32 1, %s605_s12   ;;  %s26_s24 = sadd.s32 1, %s601_s11 }
   0xf   : > { %s845_s17 = scalar_select %p667_p8, 1, 0 }
  0x10   : > { %p421_p10 = pneg %p667_p8  ;;  %s23_s22 = ssub.s32 %s605_s12, %s675_s20 }
  0x11   : > { %p685_p12 = scmp.eq.s32.totalorder %s23_s22, 0  ;;  %s477_s27 = scalar_lea.hbm %s838_s1, 64 }
  0x12   : > { %p679_p11 = pnand %p421_p10, %p840_p1  ;;  %p478_p0 = scmp.ne.s32.totalorder %s838_s1, %s477_s27 }
  0x13   : > { %s847_s23 = scalar_select %p685_p12, 1, 0 }
  0x14   : > { %p479_p3 = pneg %p679_p11  ;;  %p484_p10 = scmp.lt.u32.totalorder %s477_s27, %s838_s1 }
  0x16   : > { %p480_p5 = pnand %p479_p3, %p478_p0 }
  0x18   : > { %p481_p7 = pneg %p480_p5 }
  0x1a   : > { %p486_p9 = pnand %p484_p10, %p481_p7 }
  0x1c   : > { %489 = shalt.err (!%p486_p9)
}
  0x1d   : > { %s490_s4 = scalar_lea.vmem %s111_s19, 64  ;;  %p498_p6 = scmp.lt.s32.totalorder %s111_s19, %s111_s19 }
  0x1e   : > { %p491_p1 = scmp.ne.s32.totalorder %s111_s19, %s490_s4  ;;  %p499_p4 = scmp.lt.s32.totalorder %s490_s4, %s490_s4 }
  0x20   : > { %p493_p2 = pnand %p491_p1, %p479_p3  ;;  %p500_p8 = por %p499_p4, %p498_p6 }
  0x22   : > { %p494_p13 = pneg %p493_p2 }
  0x24   : > { %p501_p12 = pnand %p500_p8, %p494_p13 }
  0x26   : > { %504 = shalt.err (!%p501_p12)
}
  0x27   : > { %424 = dma.hbm_to_vmem [thread:$0]  (!%p679_p11), %s838_s1, 64, %s111_s19, [#allocation6]  }
  0x28   : > { %p848_p1 = scmp.ne.s32.totalorder %s847_s23, 0  ;;  %p34_p2 = scmp.eq.s32.totalorder %s605_s12, 0 }
  0x29   : > { %p849_p4 = scmp.ne.s32.totalorder %s601_s11, %s597_s10  ;;  %p850_p6 = scmp.eq.s32.totalorder %s648_s13, 1 }
  0x2a   : > { %s711_s7 = scalar_select %p848_p1, %s601_s11, %s26_s24  }
  0x2b   : > { %p719_p8 = por %p850_p6, %p849_p4  ;;  %p434_p9 = scmp.lt.s32.totalorder %s605_s12, 2 }
  0x2c   : > { %s121_s14 = sand.u32 1, %s601_s11   ;;  %p852_p12 = pmov %p849_p4 }
  0x2d   : > { %s389_s18 = sshll.u32 %s121_s14, 3  ;;  %s404_s21 = sshll.u32 %s605_s12, 7 }
  0x2e   : > { %p35_p13 = por %p34_p2, %p852_p12  ;;  %s732_s19 = scalar_lea.hbm %s837_s0, %s404_s21 }
  0x2f   : > { %s125_s23 = scalar_lea.vmem [#allocation2], %s389_s18  ;;  %s122_s27 = scalar_lea.sflag [#allocation3], %s121_s14 }
  0x30   : > { %s133_s24 = sshll.u32 %s125_s23, 4  ;;  %p734_p11 = pnand %p434_p9, %p35_p13  ;;  %s738_s24 = int_to_ptr.vmem [resolvable:$true] %s133_s24 }
  0x31   : > { %s505_s28 = scalar_lea.hbm %s732_s19, 128  ;;  %s510_s3 = scalar_lea.hbm %s837_s0, 256 }
  0x32   : > { %p506_p0 = scmp.ne.s32.totalorder %s732_s19, %s505_s28  ;;  %p507_p3 = pneg %p734_p11 }
  0x33   : > { %p511_p10 = scmp.lt.u32.totalorder %s732_s19, %s837_s0  ;;  %p512_p1 = scmp.lt.u32.totalorder %s510_s3, %s505_s28 }
  0x34   : > { %p508_p5 = pnand %p507_p3, %p506_p0  ;;  %p514_p4 = scmp.lt.u32.totalorder %s505_s28, %s732_s19 }
  0x35   : > { %p513_p2 = por %p512_p1, %p511_p10 }
  0x36   : > { %p509_p7 = pneg %p508_p5 }
  0x37   : > { %p515_p6 = por %p514_p4, %p513_p2 }
  0x39   : > { %p516_p9 = pnand %p515_p6, %p509_p7 }
  0x3b   : > { %519 = shalt.err (!%p516_p9)
}
  0x3c   : > { %s520_s6 = scalar_lea.vmem %s738_s24, 128  ;;  %s608_s14 = smov [#allocation2]  }
  0x3d   : > { %p521_p12 = scmp.ne.s32.totalorder %s738_s24, %s520_s6  ;;  %s525_s18 = sshll.u32 %s608_s14, 4  ;;  %s526_s18 = int_to_ptr.vmem [resolvable:$false] %s525_s18 }
  0x3e   : > { %s527_s21 = scalar_lea.vmem %s526_s18, 256  ;;  %p528_p5 = scmp.lt.s32.totalorder %s738_s24, %s526_s18 }
  0x3f   : > { %p523_p13 = pnand %p521_p12, %p507_p3  ;;  %p529_p10 = scmp.lt.s32.totalorder %s527_s21, %s520_s6 }
  0x41   : > { %p524_p0 = pneg %p523_p13  ;;  %p530_p1 = por %p529_p10, %p528_p5 }
  0x43   : > { %p531_p2 = pnand %p530_p1, %p524_p0 }
  0x45   : > { %534 = shalt.err (!%p531_p2)
}
  0x46   : > { %428 = dma.hbm_to_vmem [thread:$0]  (!%p734_p11), %s732_s19, 128, %s738_s24, %s122_s27  }
  0x47   : > { %p854_p7 = scmp.ne.s32.totalorder %s845_s17, 0 }
  0x48   : > { %s768_s22 = sand.u32 (!%p854_p7), 1, %s597_s10   ;;  %p855_p3 = scmp.ne.s32.totalorder (!%p854_p7), %s843_s15, 0 }
  0x49   : > { %142 = sbr.rel (%p854_p7) target bundleno = 640 (0x280), region = 28  ;;  %s393_s25 = sshll.u32 (!%p854_p7), %s768_s22, 3 }
  0x4a   : > { %s145_s23 = scalar_lea.sflag (!%p854_p7), [#allocation3], %s768_s22  ;;  %s148_s28 = scalar_lea.vmem (!%p854_p7), [#allocation2], %s393_s25 }
  0x50   : > { %580 = dma.done.wait (%p855_p3), %s145_s23, 128  }
  0x51   : > { %582 = vsyncadd (%p855_p3), %s145_s23, 4294967168  ;;  %p856_p11 = scmp.eq.s32.totalorder %s648_s13, 0 }
  0x53   : > { %584 = dma.done.wait (%p856_p11), [#allocation6], 64   ;;  %p857_p4 = pmov %p856_p11 }
  0x54   : > { %vm178_vm0 = vcmask 1043456   ;;  %v173_v0 = vld [vmem:[%s148_s28] sm:$0xff]  ;;  %v609_v8 = vmov 0.0   ;;  %vm610_vm1 = vmmov 0   ;;  %vm191_vm2 = vcmask 7168   ;;  %s405_s15 = sshll.u32 %s648_s13, 7 }
  0x55   : > { %586 = vsyncadd (%p857_p4), [#allocation6], 4294967232  ;;  %v176_v1 = vcombine.high %v173_v0, %v173_v0  ;;  %v179_v2 = vsel %vm178_vm0, %v173_v0, 0.0  ;;  %v186_v4 = vsel %vm178_vm0, %v173_v0, -inf  ;;  %408 = vmatprep.subr.mxu0 %v609_v8  ;;  %410 = vmatprep.mubr.msk.f32.mxu0 %vm610_vm1, %v609_v8  ;;  %v174_v12 = vld [vmem:[#allocation5] sm:$0xf]  ;;  %s793_s27 = scalar_lea.hbm %s839_s2, %s405_s15 }
  0x56   : > { %vm193_vm3 = vcmask 31744   ;;  %vm273_vm5 = vcmask 11264   ;;  %s172_s17 = scalar_lea.vmem [#allocation7], %s393_s25  ;;  %s291_s29 = scalar_lea.sflag [#allocation4], %s768_s22 }
  0x57   : > { %v180_v3 = vsel %vm178_vm0, %v176_v1, 0.0  ;;  %v187_v5 = vsel %vm178_vm0, %v176_v1, -inf  ;;  %s305_s19 = sshll.u32 %s172_s17, 4  ;;  %s611_s13 = smov [#allocation7]   ;;  %s795_s19 = int_to_ptr.vmem [resolvable:$true] %s305_s19 }
  0x58   : > { %v181_v6 = vadd.f32 %v180_v3, %v179_v2  ;;  %v188_v7 = vmax.f32 %v186_v4, %v187_v5  ;;  %s535_s30 = scalar_lea.vmem %s795_s19, 128  ;;  %s539_s3 = sshll.u32 %s611_s13, 4  ;;  %s540_s3 = int_to_ptr.vmem [resolvable:$false] %s539_s3 }
  0x59   : > { %p536_p6 = scmp.ne.s32.totalorder %s795_s19, %s535_s30  ;;  %s541_s4 = scalar_lea.vmem %s540_s3, 256 }
  0x5a   : > { %182 = vadd.xlane.f32.xlu0 %v181_v6  ;;  %p542_p13 = scmp.lt.s32.totalorder %s795_s19, %s540_s3  ;;  %p543_p0 = scmp.lt.s32.totalorder %s541_s4, %s535_s30 }
  0x5b   : > { %p537_p9 = pnand %p536_p6, %p719_p8 }
  0x5c   : > { %p544_p5 = por %p543_p0, %p542_p13 }
  0x5d   : > { %p538_p12 = pneg %p537_p9 }
  0x5e   : > { %189 = vmax.xlane.f32.xlu0 %v188_v7 }
  0x5f   : > { %p545_p10 = pnand %p544_p5, %p538_p12 }
  0xe7   : > { %v183_v9 = vpop.xlane.xlu0 %182 }
  0xe8   : > { %v185_v10 = vmul.f32 0.00390625, %v183_v9 }
  0xeb   : > { %v190_v11 = vpop.xlane.xlu0 %189 }
  0xec   : > { %v192_v13 = vsel %vm191_vm2, %v185_v10, %v190_v11 }
  0xed   : > { %409 = vmatpush3.msk.msra.mxu0 %vm178_vm0, %v192_v13 }
  0xee   : > { %411 = vmatmul.mubr.msk.f32.vlgmr.msra.gmra.mrb[0].mxu0 %vm193_vm3, %v174_v12 }
 0x1c1   : > { %v266_v14 = vpop.f32.mrb[0].mxu0 }
 0x1c2   : > { %v271_v15 = vmul.f32 0.1, %v266_v14  ;;  %v412_v16 = vpop.f32.mrb[1].mxu0  ;;  %vm270_vm4 = vcmp.gt.f32.partialorder %v266_v14, 0.0 }
 0x1c4   : > { %v272_v17 = vsel %vm270_vm4, %v266_v14, %v271_v15 }
 0x1c5   : > { %v274_v18 = vsel %vm273_vm5, %v272_v17, 0.0 }
 0x1c6   : > { %275 = vadd.xlane.f32.xlu1 %v274_v18 }
 0x253   : > { %v276_v19 = vpop.xlane.xlu1 %275 }
 0x254   : > { %v398_v20 = vmul.f32 -1.442695, %v276_v19 }
 0x256   : > { %473 = vpow2.f32 %v398_v20 }
 0x260   : > { %v474_v21 = vpop.eup %473 }
 0x261   : > { %v280_v22 = vadd.f32 1.0, %v474_v21 }
 0x263   : > { %475 = vrcp.f32 %v280_v22 }
 0x26d   : > { %v476_v23 = vpop.eup %475 }
 0x26e   : > { %v283_v24 = vmul.f32 %v476_v23, %v173_v0  ;;  %v284_v25 = vmul.f32 %v476_v23, %v176_v1 }
 0x270   : > { %v287_v26 = vcombine.low %v283_v24, %v284_v25 }
 0x272   : > { %289 = vst [vmem:[%s172_s17] sm:$0xff] %v287_v26 }
 0x273   : > { %548 = shalt.err (!%p545_p10)
}
 0x274   : > { %s549_s5 = scalar_lea.hbm %s793_s27, 128  ;;  %s553_s18 = scalar_lea.hbm %s839_s2, 256 }
 0x275   : > { %p550_p1 = scmp.ne.s32.totalorder %s793_s27, %s549_s5  ;;  %p554_p3 = scmp.lt.u32.totalorder %s793_s27, %s839_s2 }
 0x276   : > { %p555_p11 = scmp.lt.u32.totalorder %s553_s18, %s549_s5  ;;  %p557_p6 = scmp.lt.u32.totalorder %s549_s5, %s793_s27 }
 0x277   : > { %p551_p2 = pnand %p550_p1, %p719_p8 }
 0x278   : > { %p556_p4 = por %p555_p11, %p554_p3 }
 0x279   : > { %p552_p7 = pneg %p551_p2 }
 0x27a   : > { %p558_p9 = por %p557_p6, %p556_p4 }
 0x27c   : > { %p559_p12 = pnand %p558_p9, %p552_p7 }
 0x27e   : > { %562 = shalt.err (!%p559_p12)
}
 0x27f   : > { %419 = dma.vmem_to_hbm [thread:$0]  (%p719_p8), %s795_s19, 128, %s793_s27, %s291_s29  }
 0x280 PF: > { %s317_s25 = sand.u32 1, %s593_s9   ;;  %p858_p13 = scmp.ne.s32.totalorder %s844_s16, 0 }
 0x281   : > { %p859_p0 = scmp.ge.s32.totalorder %s605_s12, 2  ;;  %s318_s23 = scalar_lea.sflag [#allocation4], %s317_s25 }
 0x283   : > { %p430_p5 = pnand %p859_p0, %p858_p13 }
 0x285   : > { %588 = dma.done.wait (!%p430_p5), %s318_s23, 128  }
 0x286   : > { %590 = vsyncadd (!%p430_p5), %s318_s23, 4294967168  ;;  %p16_p10 = scmp.ge.s32.totalorder %s675_s20, 4   ;;  %s860_s9 = smov %s597_s10 }
 0x287   : > { %s861_s10 = smov %s601_s11  ;;  %s862_s11 = smov %s711_s7 }
 0x288   : > { %s863_s12 = smov %s675_s20  ;;  %18 = sbr.rel (!%p16_p10) target bundleno = 6 (0x6), region = 77 }
 0x28f   :  { %323 = vsyncpa [#allocation3], 1 }
 0x290   :  { %325 = vsyncpa [#allocation3 + $0x1], 1 }
 0x291   :  { %326 = vsyncpa [#allocation6], 1 }
 0x292   :  { %327 = vsyncpa [#allocation4], 1 }
 0x293   :  { %329 = vsyncpa [#allocation4 + $0x1], 1 }

</bundles_post_ra>
